<compile_context>
chip_gen: v7x
topology: tpu7x:2x2x1
jax: 0.10.0
libtpu: 0.0.40
codegen_flags: <defaults>
</compile_context>

<pallas_src>
import functools

import jax
import jax.numpy as jnp
from jax.experimental import pallas as pl
from jax.experimental.pallas import tpu as pltpu


def _round_up(x: int, m: int) -> int:
    return ((x + m - 1) // m) * m


def _cdiv(a: int, b: int) -> int:
    return -(-a // b)


def _linear_kernel(x_ref, w_ref, b_ref, o_ref, *, V, TK):
    # x_ref: [TB, TK] f32 tile of bow_vec (unpadded HBM input; ragged edges OK)
    # w_ref: [V_pad, L_pad] bf16, fully VMEM-resident (constant index_map)
    # b_ref: [1, L_pad]  f32, resident
    # o_ref: [TB, L_pad] f32, resident across the reduction axis -> accumulator
    k = pl.program_id(1)

    @pl.when(k == 0)
    def _():
        o_ref[...] = jnp.zeros_like(o_ref)

    x = x_ref[...]
    if V % TK != 0:
        # Zero the ragged vocab tail (only the last k block is actually partial;
        # the compare+select is VPU filler under the HBM roofline).
        col = jax.lax.broadcasted_iota(jnp.int32, x.shape, 1) + k * TK
        x = jnp.where(col < V, x, 0.0)
    xb = x.astype(jnp.bfloat16)                      # per-tile cast on the VPU

    start = pl.multiple_of(k * TK, 128)
    w_tile = w_ref[pl.ds(start, TK), :]              # [TK, L_pad], aligned slice
    o_ref[...] += jnp.dot(xb, w_tile, preferred_element_type=jnp.float32)

    @pl.when(k == pl.num_programs(1) - 1)
    def _():
        o_ref[...] += b_ref[...]


def prepare_params(weight, bias, *, tk=8192):
    """One-time parameter prep (NOT per forward call).

    Pads L -> multiple of 128 (lane-dense output / weight lanes), pads V to a
    multiple of the reduction tile TK, casts to bf16 and pre-transposes to
    [V_pad, L_pad] so the kernel runs a plain MXU matmul.
    """
    L, V = weight.shape
    L_pad = _round_up(L, 128)
    TK = min(tk, _round_up(V, 128))
    V_pad = _round_up(V, TK)
    w_t = jnp.pad(weight, ((0, L_pad - L), (0, V_pad - V))).astype(jnp.bfloat16).T
    b2d = jnp.pad(bias, (0, L_pad - L)).reshape(1, L_pad).astype(jnp.float32)
    return w_t, b2d, TK


@functools.partial(jax.jit, static_argnames=("num_labels", "tk", "tb"))
def logistic_regression_bow(bow_vec, w_t, b2d, *, num_labels, tk=8192, tb=256):
    """Forward pass: bow_vec [B, V] f32 -> logits [B, num_labels] f32."""
    B, V = bow_vec.shape
    V_pad, L_pad = w_t.shape
    TK = min(tk, V_pad)
    assert V_pad % TK == 0, "params must come from prepare_params(weight, bias, tk=tk)"

    # Batch tile: multiple of 16 (bf16 MXU operand packing); if B allows, keep at
    # least two batch blocks so the 'parallel' axis shards across v7x's 2 TCs.
    TB = min(tb, _round_up(B, 16))
    if _round_up(B, 16) > 16:
        TB = min(TB, _round_up(_cdiv(B, 2), 16))
    nb = _cdiv(B, TB)
    nk = V_pad // TK
    B_pad = nb * TB

    # VMEM footprint (2 buffers per pipelined operand), capped v7x-safe.
    vmem_bytes = (2 * V_pad * L_pad * 2      # resident bf16 weight
                  + 2 * TB * TK * 4          # double-buffered f32 x tiles
                  + 2 * TB * L_pad * 4       # double-buffered f32 output/acc
                  + 2 * L_pad * 4)           # bias
    vmem_limit = int(min(max(vmem_bytes + (4 << 20), 32 << 20), 56 << 20))

    kernel = functools.partial(_linear_kernel, V=V, TK=TK)
    out = pl.pallas_call(
        kernel,
        out_shape=jax.ShapeDtypeStruct((B_pad, L_pad), jnp.float32),
        grid_spec=pltpu.PrefetchScalarGridSpec(
            num_scalar_prefetch=0,
            grid=(nb, nk),
            in_specs=[
                pl.BlockSpec((TB, TK), lambda i, k: (i, k)),        # x tiles (f32)
                pl.BlockSpec((V_pad, L_pad), lambda i, k: (0, 0)),  # resident W^T
                pl.BlockSpec((1, L_pad), lambda i, k: (0, 0)),      # resident bias
            ],
            out_specs=pl.BlockSpec((TB, L_pad), lambda i, k: (i, 0)),
        ),
        compiler_params=pltpu.CompilerParams(
            dimension_semantics=("parallel", "arbitrary"),
            vmem_limit_bytes=vmem_limit),
    )(bow_vec, w_t, b2d)

    return out[:B, :num_labels]


if __name__ == "__main__":
    # Small deterministic shapes: batch=12 BoW vectors over a 250-word vocab,
    # 10 labels.  V=250 is not a multiple of 128 (exercises the ragged-tail
    # mask) and tk=128 gives nk=2 reduction steps (exercises the accumulator).
    B, V, L = 12, 250, 10

    key = jax.random.PRNGKey(0)
    k_x, k_w, k_b = jax.random.split(key, 3)

    bow_vec = jax.random.normal(k_x, (B, V), dtype=jnp.float32)
    # Deterministic parameter init (mimics nn.Linear's uniform(-1/sqrt(V), 1/sqrt(V)))
    bound = 1.0 / jnp.sqrt(jnp.float32(V))
    weight = jax.random.uniform(k_w, (L, V), minval=-bound, maxval=bound,
                                dtype=jnp.float32)
    bias = jax.random.uniform(k_b, (L,), minval=-bound, maxval=bound,
                              dtype=jnp.float32)

    # One-time parameter prep (pad + bf16 cast + transpose) -- not per call.
    w_t, b2d, TK = prepare_params(weight, bias, tk=128)

    logits = logistic_regression_bow(bow_vec, w_t, b2d, num_labels=L, tk=TK)
    jax.block_until_ready(logits)
    assert logits.shape == (B, L)
    assert logits.dtype == jnp.float32

    # Reference with the same bf16-operand / f32-accumulate numerics as the kernel.
    ref_bf16 = jnp.dot(bow_vec.astype(jnp.bfloat16),
                       weight.astype(jnp.bfloat16).T,
                       preferred_element_type=jnp.float32) + bias
    assert jnp.allclose(logits, ref_bf16, atol=1e-4, rtol=1e-4)

    # Looser check against the pure-f32 torch-equivalent forward.
    ref_f32 = bow_vec @ weight.T + bias
    assert jnp.allclose(logits, ref_f32, atol=3e-2, rtol=3e-2)

    print("KERNEL_OK")
</pallas_src>

<mosaic_0001>
module attributes {stable_mosaic.version = 11 : i64} {
  func.func @_linear_kernel(%arg0: i32, %arg1: i32, %arg2: memref<16x128xf32, #tpu.memory_space<vmem>>, %arg3: memref<256x128xbf16, #tpu.memory_space<vmem>>, %arg4: memref<1x128xf32, #tpu.memory_space<vmem>>, %arg5: memref<16x128xf32, #tpu.memory_space<vmem>>) attributes {dimension_semantics = [#tpu.dimension_semantics<parallel>, #tpu.dimension_semantics<arbitrary>], iteration_bounds = array<i64: 1, 2>, scalar_prefetch = 0 : i64, scratch_operands = 0 : i64, tpu.core_type = #tpu.core_type<tc>, window_params = [{transform_indices = @transform_0, window_bounds = array<i64: 16, 128>}, {pipeline_mode = #tpu.pipeline_mode<synchronous>, transform_indices = @transform_1, window_bounds = array<i64: 256, 128>}, {pipeline_mode = #tpu.pipeline_mode<synchronous>, transform_indices = @transform_2, window_bounds = array<i64: 1, 128>}, {transform_indices = @transform_3, window_bounds = array<i64: 16, 128>}]} {
    %c0_i32 = arith.constant 0 : i32
    %0 = arith.cmpi eq, %arg1, %c0_i32 : i32
    %1 = arith.extui %0 : i1 to i32
    %c0_i32_0 = arith.constant 0 : i32
    %2 = arith.cmpi ne, %1, %c0_i32_0 : i32
    scf.if %2 {
      %cst_10 = arith.constant 0.000000e+00 : f32
      %24 = vector.broadcast %cst_10 : f32 to vector<16x128xf32>
      %c0_11 = arith.constant 0 : index
      %c0_12 = arith.constant 0 : index
      %25 = vector.load %arg5[%c0_11, %c0_12] : memref<16x128xf32, #tpu.memory_space<vmem>>, vector<16x128xf32>
      tpu.vector_store %arg5[%c0_11, %c0_12], %24 {strides = array<i32>} : memref<16x128xf32, #tpu.memory_space<vmem>>, vector<16x128xf32>,
    } else {
    }
    %c0 = arith.constant 0 : index
    %c0_1 = arith.constant 0 : index
    %3 = vector.load %arg2[%c0, %c0_1] : memref<16x128xf32, #tpu.memory_space<vmem>>, vector<16x128xf32>
    %4 = tpu.iota {dimensions = array<i32: 1>} : vector<16x128xi32>
    %c128_i32 = arith.constant 128 : i32
    %5 = arith.muli %arg1, %c128_i32 : i32
    %6 = vector.broadcast %5 : i32 to vector<16x128xi32>
    %7 = arith.addi %4, %6 : vector<16x128xi32>
    %c250_i32 = arith.constant 250 : i32
    %8 = vector.broadcast %c250_i32 : i32 to vector<16x128xi32>
    %9 = arith.cmpi slt, %7, %8 : vector<16x128xi32>
    %cst = arith.constant 0.000000e+00 : f32
    %10 = vector.broadcast %cst : f32 to vector<16x128xf32>
    %11 = arith.select %9, %3, %10 : vector<16x128xi1>, vector<16x128xf32>
    %12 = arith.truncf %11 : vector<16x128xf32> to vector<16x128xbf16>
    %c128_i32_2 = arith.constant 128 : i32
    %13 = arith.muli %arg1, %c128_i32_2 : i32
    %14 = tpu.assume_multiple %13, 128 : i32
    %15 = arith.index_cast %14 : i32 to index
    %c0_3 = arith.constant 0 : index
    %16 = vector.load %arg3[%15, %c0_3] : memref<256x128xbf16, #tpu.memory_space<vmem>>, vector<128x128xbf16>
    %c0_4 = arith.constant 0 : index
    %c0_5 = arith.constant 0 : index
    %17 = vector.load %arg5[%c0_4, %c0_5] : memref<16x128xf32, #tpu.memory_space<vmem>>, vector<16x128xf32>
    %cst_6 = arith.constant dense<0.000000e+00> : vector<16x128xf32>
    %18 = tpu.matmul %12, %16, %cst_6 {dimension_numbers = #tpu.dot_dimension_numbers<[1], [0], [0], [1], [0, 0, 1, 1], [], []>} : vector<16x128xbf16>, vector<128x128xbf16>, vector<16x128xf32> -> vector<16x128xf32>
    %19 = arith.addf %17, %18 : vector<16x128xf32>
    %c0_7 = arith.constant 0 : index
    %c0_8 = arith.constant 0 : index
    %20 = vector.load %arg5[%c0_7, %c0_8] : memref<16x128xf32, #tpu.memory_space<vmem>>, vector<16x128xf32>
    tpu.vector_store %arg5[%c0_7, %c0_8], %19 {strides = array<i32>} : memref<16x128xf32, #tpu.memory_space<vmem>>, vector<16x128xf32>,
    %c1_i32 = arith.constant 1 : i32
    %21 = arith.cmpi eq, %arg1, %c1_i32 : i32
    %22 = arith.extui %21 : i1 to i32
    %c0_i32_9 = arith.constant 0 : i32
    %23 = arith.cmpi ne, %22, %c0_i32_9 : i32
    scf.if %23 {
      %c0_10 = arith.constant 0 : index
      %c0_11 = arith.constant 0 : index
      %24 = vector.load %arg5[%c0_10, %c0_11] : memref<16x128xf32, #tpu.memory_space<vmem>>, vector<16x128xf32>
      %c0_12 = arith.constant 0 : index
      %c0_13 = arith.constant 0 : index
      %25 = vector.load %arg4[%c0_12, %c0_13] : memref<1x128xf32, #tpu.memory_space<vmem>>, vector<1x128xf32>
      %26 = vector.broadcast %25 : vector<1x128xf32> to vector<16x128xf32>
      %27 = arith.addf %24, %26 : vector<16x128xf32>
      %c0_14 = arith.constant 0 : index
      %c0_15 = arith.constant 0 : index
      %28 = vector.load %arg5[%c0_14, %c0_15] : memref<16x128xf32, #tpu.memory_space<vmem>>, vector<16x128xf32>
      tpu.vector_store %arg5[%c0_14, %c0_15], %27 {strides = array<i32>} : memref<16x128xf32, #tpu.memory_space<vmem>>, vector<16x128xf32>,
    } else {
    }
    return
  }
  func.func @transform_0(%arg0: i32, %arg1: i32) -> (i32, i32) {
    %c0_i32 = arith.constant 0 : i32
    return %arg0, %arg1 : i32, i32
  }
  func.func @transform_1(%arg0: i32, %arg1: i32) -> (i32, i32) {
    %c0_i32 = arith.constant 0 : i32
    %c0_i32_0 = arith.constant 0 : i32
    %c0_i32_1 = arith.constant 0 : i32
    return %c0_i32, %c0_i32_0 : i32, i32
  }
  func.func @transform_2(%arg0: i32, %arg1: i32) -> (i32, i32) {
    %c0_i32 = arith.constant 0 : i32
    %c0_i32_0 = arith.constant 0 : i32
    %c0_i32_1 = arith.constant 0 : i32
    return %c0_i32, %c0_i32_0 : i32, i32
  }
  func.func @transform_3(%arg0: i32, %arg1: i32) -> (i32, i32) {
    %c0_i32 = arith.constant 0 : i32
    %c0_i32_0 = arith.constant 0 : i32
    return %arg0, %c0_i32 : i32, i32
  }
}

</mosaic_0001>

<bundles_post_ra>
// kernel: logistic_regression_bow.1
= control target key start
LH: loop header
LB: loop body
LE: loop exit
PB: predicated region body
PF: predicated region fallthrough
CT: control target
= control target key end

     0   :  { %8 = vsyncpa [#allocation3], 0  ;;  %s976_s0 = inlined_call_operand.hbm [shape: f32[12,250], index: 0, kind: input, shape index: {}]   ;;  %s977_s1 = inlined_call_operand.hbm [shape: bf16[256,128], index: 1, kind: input, shape index: {}]   ;;  %s978_s2 = inlined_call_operand.vmem [shape: f32[1,128], index: 2, kind: input, shape index: {}]   ;;  %s979_s3 = inlined_call_operand.hbm [shape: f32[16,128], index: 3, kind: output, shape index: {}]  }
   0x1   :  { %10 = vsyncpa [#allocation3 + $0x1], 0 }
   0x2   :  { %11 = vsyncpa [#allocation6], 0 }
   0x3   :  { %12 = vsyncpa [#allocation4], 0  ;;  %s778_s12 = smov 0   ;;  %s780_s13 = smov 0  }
   0x4   :  { %s782_s14 = smov 0   ;;  %s784_s15 = smov 0  }
   0x5   :  { %s786_s16 = smov 0   ;;  %s788_s17 = smov 0  }
   0x6 LB: > { %s452_s18 = sadd.s32 4294967295, %s743_s17   ;;  %p46_p0 = scmp.ne.s32.totalorder %s731_s14, %s727_s13  ;;  %s743_s17 = sphi %s788_s17, %s18_s17   ;;  %s739_s16 = sphi %s786_s16, %s1000_s16   ;;  %s735_s15 = sphi %s784_s15, %s999_s15   ;;  %s731_s14 = sphi %s782_s14, %s998_s14   ;;  %s727_s13 = sphi %s780_s13, %s997_s13   ;;  %s723_s12 = sphi %s778_s12, %s996_s12  }
   0x7   : > { %p47_p1 = scmp.eq.s32.totalorder %s743_s17, 0  ;;  %p52_p2 = scmp.ne.s32.totalorder %s727_s13, %s723_s12 }
   0x8   : > { %p813_p3 = scmp.eq.s32.totalorder %s452_s18, 0  ;;  %p453_p4 = scmp.ge.s32.totalorder %s743_s17, 1 }
   0x9   : > { %p48_p5 = por %p47_p1, %p46_p0  ;;  %p131_p6 = scmp.lt.s32.totalorder %s743_s17, 3 }
   0xa   : > { %s985_s19 = scalar_select %p813_p3, 1, 0 }
   0xb   : > { %p821_p7 = por %p813_p3, %p52_p2  ;;  %p825_p8 = pnand %p453_p4, %p131_p6 }
   0xc   : > { %s745_s22 = smov [#allocation5]   ;;  %p529_p11 = scmp.lt.s32.totalorder %s743_s17, 2 }
   0xd   : > { %s986_s20 = scalar_select %p821_p7, 1, 0 }
   0xe   : > { %s987_s21 = scalar_select %p825_p8, 1, 0 }
   0xf   : > { %s143_s23 = sshll.u32 %s745_s22, 4  ;;  %p520_p9 = pneg %p825_p8  ;;  %s144_s23 = int_to_ptr.vmem [resolvable:$true] %s143_s23 }
  0x10   : > { %s39_s25 = sadd.s32 1, %s731_s14  ;;  %p839_p12 = pnand %p529_p11, %p48_p5 }
  0x11   : > { %p833_p10 = pnand %p520_p9, %p813_p3  ;;  %s601_s29 = scalar_lea.hbm %s977_s1, 2048 }
  0x12   : > { %s989_s26 = scalar_select %p839_p12, 1, 0 }
  0x13   : > { %p602_p13 = scmp.ne.s32.totalorder %s977_s1, %s601_s29  ;;  %p603_p0 = pneg %p833_p10 }
  0x14   : > { %p608_p4 = scmp.lt.u32.totalorder %s601_s29, %s977_s1 }
  0x15   : > { %p604_p1 = pnand %p603_p0, %p602_p13 }
  0x17   : > { %p605_p2 = pneg %p604_p1 }
  0x19   : > { %p610_p5 = pnand %p608_p4, %p605_p2 }
  0x1b   : > { %613 = shalt.err (!%p610_p5)
}
  0x1c   : > { %s614_s7 = scalar_lea.vmem %s144_s23, 2048  ;;  %p622_p3 = scmp.lt.s32.totalorder %s144_s23, %s144_s23 }
  0x1d   : > { %p615_p6 = scmp.ne.s32.totalorder %s144_s23, %s614_s7  ;;  %p623_p7 = scmp.lt.s32.totalorder %s614_s7, %s614_s7 }
  0x1f   : > { %p617_p9 = pnand %p615_p6, %p603_p0  ;;  %p624_p8 = por %p623_p7, %p622_p3 }
  0x21   : > { %p618_p11 = pneg %p617_p9 }
  0x23   : > { %p625_p12 = pnand %p624_p8, %p618_p11 }
  0x25   : > { %628 = shalt.err (!%p625_p12)
}
  0x26   : > { %s746_s8 = smov 64   ;;  %s747_s9 = smov 4  }
  0x27   : > { %523 = dma.hbm_to_vmem [thread:$0]  (!%p833_p10), %s977_s1, 2048, %s144_s23, [#allocation6], %s746_s8, %s746_s8, %s747_s9  }
  0x28   : > { %s27_s12 = sadd.s32 1, %s739_s16  ;;  %s160_s22 = sand.u32 1, %s731_s14  }
  0x29   : > { %p28_p3 = scmp.ge.s32.totalorder %s27_s12, 2  ;;  %s456_s27 = sshll.u32 %s160_s22, 4 }
  0x2a   : > { %s457_s28 = sshll.u32 %s739_s16, 7  ;;  %s164_s23 = scalar_lea.vmem [#allocation2], %s456_s27 }
  0x2b   : > { %s1002_s12 = smov (%p28_p3, %s27_s12), 0  ;;  %s867_s4 = scalar_lea.hbm %s976_s0, %s457_s28 }
  0x2c   : > { %s35_s24 = ssub.s32 %s739_s16, %s1002_s12  ;;  %s173_s5 = sshll.u32 %s164_s23, 4  ;;  %s871_s5 = int_to_ptr.vmem [resolvable:$true] %s173_s5 }
  0x2d   : > { %p37_p7 = scmp.eq.s32.totalorder %s35_s24, 0  ;;  %s878_s7 = scalar_lea.sflag [#allocation3], %s160_s22 }
  0x2e   : > { %s629_s8 = scalar_lea.hbm %s867_s4, 256  ;;  %p990_p10 = scmp.ne.s32.totalorder %s989_s26, 0 }
  0x2f   : > { %s876_s6 = scalar_select %p37_p7, %s731_s14, %s39_s25  }
  0x30   : > { %p630_p8 = scmp.ne.s32.totalorder %s867_s4, %s629_s8  ;;  %p631_p12 = pneg %p990_p10 }
  0x31   : > { %s634_s11 = scalar_lea.hbm %s976_s0, 512  ;;  %p635_p1 = scmp.lt.u32.totalorder %s867_s4, %s976_s0 }
  0x32   : > { %p632_p13 = pnand %p631_p12, %p630_p8  ;;  %p636_p2 = scmp.lt.u32.totalorder %s634_s11, %s629_s8 }
  0x33   : > { %p638_p5 = scmp.lt.u32.totalorder %s629_s8, %s867_s4 }
  0x34   : > { %p633_p0 = pneg %p632_p13  ;;  %p637_p4 = por %p636_p2, %p635_p1 }
  0x36   : > { %p639_p6 = por %p638_p5, %p637_p4 }
  0x38   : > { %p640_p9 = pnand %p639_p6, %p633_p0 }
  0x3a   : > { %643 = shalt.err (!%p640_p9)
}
  0x3b   : > { %s644_s25 = scalar_lea.vmem %s871_s5, 256  ;;  %s748_s22 = smov [#allocation2]  }
  0x3c   : > { %p645_p11 = scmp.ne.s32.totalorder %s871_s5, %s644_s25  ;;  %s649_s29 = sshll.u32 %s748_s22, 4  ;;  %s650_s29 = int_to_ptr.vmem [resolvable:$false] %s649_s29 }
  0x3d   : > { %s651_s30 = scalar_lea.vmem %s650_s29, 512  ;;  %p652_p8 = scmp.lt.s32.totalorder %s871_s5, %s650_s29 }
  0x3e   : > { %p647_p3 = pnand %p645_p11, %p631_p12  ;;  %p653_p13 = scmp.lt.s32.totalorder %s651_s30, %s644_s25 }
  0x40   : > { %p648_p7 = pneg %p647_p3  ;;  %p654_p1 = por %p653_p13, %p652_p8 }
  0x42   : > { %p655_p2 = pnand %p654_p1, %p648_p7 }
  0x44   : > { %658 = shalt.err (!%p655_p2)
}
  0x45   : > { %s749_s24 = smov 256   ;;  %s750_s23 = smov 128  }
  0x46   : > { %s751_s8 = smov 8   ;;  %p991_p12 = scmp.ne.s32.totalorder %s987_s21, 0 }
  0x47   : > { %527 = dma.hbm_to_vmem [thread:$0]  (!%p990_p10), %s867_s4, 256, %s871_s5, %s878_s7, %s749_s24, %s750_s23, %s751_s8  }
  0x48   : > { %185 = sbr.rel (%p991_p12) target bundleno = 381 (0x17d), region = 32  ;;  %s187_s9 = sand.u32 (!%p991_p12), 1, %s727_s13  }
  0x49   : > { %s909_s10 = sshll.u32 (!%p991_p12), %s187_s9, 4  ;;  %s188_s11 = scalar_lea.sflag (!%p991_p12), [#allocation3], %s187_s9 }
  0x4a   : > { %s191_s27 = scalar_lea.vmem (!%p991_p12), [#allocation2], %s909_s10  ;;  %p992_p0 = scmp.ne.s32.totalorder (!%p991_p12), %s986_s20, 0 }
  0x4f   : > { %710 = dma.done.wait (%p992_p0), %s188_s11, 256  }
  0x50   : > { %712 = vsyncadd (%p992_p0), %s188_s11, 4294967040  ;;  %p993_p4 = scmp.ne.s32.totalorder %s985_s19, 0 }
  0x52   : > { %714 = dma.done.wait (%p993_p4), [#allocation6], 2048  }
  0x53   : > { %716 = vsyncadd (%p993_p4), [#allocation6], 4294965248  ;;  %p461_p10 = scmp.ne.s32.totalorder %s735_s15, 0 }
  0x54   : > { %v752_v0 = vmov (!%p461_p10), 0.0  }
  0x55   : > { %219 = sbr.rel (%p461_p10) target bundleno = 92 (0x5c), region = 44  ;;  %220 = vst [vmem:[#allocation7] sm:$0xff] (!%p461_p10), %v752_v0  ;;  %221 = vst [vmem:[#allocation7 + $0x8] sm:$0xff] (!%p461_p10), %v752_v0 }
  0x5c PF: > { %s462_s21 = sshll.u32 %s735_s15, 7  ;;  %v753_v1 = vmov 0.0   ;;  %vm754_vm0 = vmmov 0   ;;  %v224_v7 = vlaneseq  ;;  %v222_v14 = vld [vmem:[%s191_s27] sm:$0xff]  ;;  %v223_v15 = vld [vmem:[%s191_s27 + $0x8] sm:$0xff]  ;;  %p475_p5 = scmp.ne.s32.totalorder %s735_s15, 1 }
  0x5d   : > { %490 = vmatprep.subr.bf16.mxu0 %v753_v1  ;;  %s233_s26 = sshra.s32 %s462_s21, 3  ;;  %506 = vmatprep.mubr.msk.bf16.mxu0 %vm754_vm0, %v753_v1  ;;  %v227_v10 = vstv %s462_s21  ;;  %v473_v16 = vpack.c.bf16 %v223_v15, %v222_v14  ;;  %v253_v17 = vld [vmem:[#allocation7] sm:$0xff]  ;;  %v254_v19 = vld [vmem:[#allocation7 + $0x8] sm:$0xff] }
  0x5e   : > { %s463_s20 = sshll.u32 %s233_s26, 2  ;;  %v225_v9 = vand.u32 127, %v224_v7  ;;  %v476_v26 = vld [vmem:[%s978_s2] ss:$0 sm:$0xff] (!%p475_p5) }
  0x5f   : > { %s236_s4 = scalar_lea.vmem [#allocation5], %s463_s20 }
  0x60   : > { %v593_v2 = vld [vmem:[%s236_s4] sm:$0xff]   ;;  %v594_v3 = vld [vmem:[%s236_s4 + $0x8] sm:$0xff]   ;;  %v595_v4 = vld [vmem:[%s236_s4 + $0x10] sm:$0xff]   ;;  %v228_v12 = vadd.s32 %v227_v10, %v225_v9 }
  0x61   : > { %491 = vmatpush3.bf16.msra.mxu0 %v593_v2  ;;  %v596_v5 = vld [vmem:[%s236_s4 + $0x18] sm:$0xff]   ;;  %v597_v6 = vld [vmem:[%s236_s4 + $0x20] sm:$0xff]   ;;  %v598_v8 = vld [vmem:[%s236_s4 + $0x28] sm:$0xff]  }
  0x62   : > { %492 = vmatprep.subr.bf16.mxu0 %v753_v1  ;;  %v599_v11 = vld [vmem:[%s236_s4 + $0x30] sm:$0xff]   ;;  %v600_v13 = vld [vmem:[%s236_s4 + $0x38] sm:$0xff]   ;;  %vm229_vm1 = vcmp.lt.s32.totalorder %v228_v12, 250 }
  0x63   : > { %vm472_vm2 = vmpackc.low %vm229_vm1, %vm229_vm1 }
  0x65   : > { %493 = vmatpush3.bf16.msra.mxu0 %v594_v3 }
  0x66   : > { %494 = vmatprep.subr.bf16.mxu0 %v753_v1 }
  0x69   : > { %495 = vmatpush3.bf16.msra.mxu0 %v595_v4 }
  0x6a   : > { %496 = vmatprep.subr.bf16.mxu0 %v753_v1 }
  0x6d   : > { %497 = vmatpush3.bf16.msra.mxu0 %v596_v5 }
  0x6e   : > { %498 = vmatprep.subr.bf16.mxu0 %v753_v1 }
  0x71   : > { %499 = vmatpush3.bf16.msra.mxu0 %v597_v6 }
  0x72   : > { %500 = vmatprep.subr.bf16.mxu0 %v753_v1 }
  0x75   : > { %501 = vmatpush3.bf16.msra.mxu0 %v598_v8 }
  0x76   : > { %502 = vmatprep.subr.bf16.mxu0 %v753_v1 }
  0x79   : > { %503 = vmatpush3.bf16.msra.mxu0 %v599_v11 }
  0x7a   : > { %504 = vmatprep.subr.bf16.mxu0 %v753_v1 }
  0x7d   : > { %505 = vmatpush3.bf16.msra.mxu0 %v600_v13 }
  0x80   : > { %507 = vmatmul.mubr.msk.bf16.vlgmr.msra.gmra.mrb[0].mxu0 %vm472_vm2, %v473_v16 }
 0x152   : > { %351 = sbr.rel (%p475_p5) target bundleno = 355 (0x163), region = 48 }
 0x153   : > { %v337_v18 = vpop.f32.mrb[0].mxu0 }
 0x154   : > { %v344_v20 = vadd.f32 %v337_v18, %v253_v17  ;;  %v508_v21 = vpop.f32.mrb[1].mxu0 }
 0x155   : > { %v340_v22 = vpop.f32.mrb[2].mxu0 }
 0x156   : > { %346 = vst [vmem:[#allocation7] sm:$0xff] %v344_v20  ;;  %v345_v23 = vadd.f32 %v340_v22, %v254_v19  ;;  %v509_v24 = vpop.f32.mrb[3].mxu0 }
 0x158   : > { %347 = vst [vmem:[#allocation7 + $0x8] sm:$0xff] %v345_v23 }
 0x15d   : > { %v352_v25 = vld [vmem:[#allocation7] sm:$0xff] }
 0x15e   : > { %v361_v28 = vadd.f32 %v476_v26, %v352_v25 }
 0x15f   : > { %v353_v27 = vld [vmem:[#allocation7 + $0x8] sm:$0xff] }
 0x160   : > { %v362_v29 = vadd.f32 %v476_v26, %v353_v27  ;;  %363 = vst [vmem:[#allocation7] sm:$0xff] %v361_v28 }
 0x162   : > { %364 = vst [vmem:[#allocation7 + $0x8] sm:$0xff] %v362_v29 }
 0x163 PF: > { %p932_p6 = scmp.eq.s32.totalorder %s452_s18, 1  ;;  %s755_s15 = smov [#allocation7]  }
 0x164   : > { %s374_s28 = sshll.u32 %s755_s15, 4  ;;  %s375_s28 = int_to_ptr.vmem [resolvable:$true] %s374_s28 }
 0x165   : > { %s659_s25 = scalar_lea.vmem %s375_s28, 256  ;;  %p666_p7 = scmp.lt.s32.totalorder %s375_s28, %s375_s28 }
 0x166   : > { %p660_p9 = scmp.ne.s32.totalorder %s375_s28, %s659_s25  ;;  %p667_p8 = scmp.lt.s32.totalorder %s659_s25, %s659_s25 }
 0x168   : > { %p661_p11 = pnand %p660_p9, %p932_p6  ;;  %p668_p13 = por %p667_p8, %p666_p7 }
 0x16a   : > { %p662_p3 = pneg %p661_p11 }
 0x16c   : > { %p669_p1 = pnand %p668_p13, %p662_p3 }
 0x16e   : > { %672 = shalt.err (!%p669_p1)
}
 0x16f   : > { %s673_s18 = scalar_lea.hbm %s979_s3, 256 }
 0x170   : > { %p674_p2 = scmp.ne.s32.totalorder %s979_s3, %s673_s18  ;;  %p679_p4 = scmp.lt.u32.totalorder %s673_s18, %s979_s3 }
 0x172   : > { %p675_p12 = pnand %p674_p2, %p932_p6 }
 0x174   : > { %p676_p0 = pneg %p675_p12 }
 0x176   : > { %p681_p10 = pnand %p679_p4, %p676_p0 }
 0x178   : > { %684 = shalt.err (!%p681_p10)
}
 0x179   : > { %s756_s9 = smov 128   ;;  %s757_s10 = smov 8  }
 0x17a   : > { %517 = dma.vmem_to_hbm [thread:$0]  (%p932_p6), %s375_s28, 256, %s979_s3, [#allocation4], %s756_s9, %s756_s9, %s757_s10  }
 0x17b   : > { %718 = dma.done.wait (%p932_p6), [#allocation4], 256  }
 0x17c   : > { %720 = vsyncadd (%p932_p6), [#allocation4], 4294967040 }
 0x17d PF: > { %s18_s17 = sadd.s32 1, %s743_s17   ;;  %s995_s21 = smov %s1002_s12 }
 0x17e   : > { %p15_p5 = scmp.ge.s32.totalorder %s18_s17, 4   ;;  %s996_s12 = smov %s727_s13 }
 0x17f   : > { %s997_s13 = smov %s731_s14  ;;  %s998_s14 = smov %s876_s6 }
 0x180   : > { %s999_s15 = smov %s739_s16  ;;  %s1000_s16 = smov %s995_s21 }
 0x181   :  { %17 = sbr.rel (!%p15_p5) target bundleno = 6 (0x6), region = 83 }
 0x188   :  { %390 = vsyncpa [#allocation3], 1 }
 0x189   :  { %392 = vsyncpa [#allocation3 + $0x1], 1 }
 0x18a   :  { %393 = vsyncpa [#allocation6], 1 }
 0x18b   :  { %394 = vsyncpa [#allocation4], 1 }
 0x18c   :  { %396 = vsyncpa [#allocation4 + $0x1], 1 }

</bundles_post_ra>
